<compile_context>
chip_gen: v5e
topology: v5e:2x2
jax: 0.10.0
libtpu: 0.0.40
codegen_flags: <defaults>
</compile_context>

<pallas_src>
import jax
import jax.numpy as jnp
from jax.experimental import pallas as pl
from jax.experimental.pallas import tpu as pltpu


def _round_up(n, m):
    return ((n + m - 1) // m) * m


def _cdiv(a, b):
    return (a + b - 1) // b


def _mlp_kernel(x_ref, w1_ref, b1_ref, w2_ref, b2_ref, w3_ref, b3_ref, o_ref):
    # Hot path: three MXU matmuls + bias + ReLU, fully fused in VMEM.
    # Operands may be f32 or bf16; accumulation and biases are always f32.
    x = x_ref[...]
    h1 = jnp.dot(x, w1_ref[...], preferred_element_type=jnp.float32) + b1_ref[...]
    h1 = jnp.maximum(h1, 0.0).astype(w2_ref.dtype)
    h2 = jnp.dot(h1, w2_ref[...], preferred_element_type=jnp.float32) + b2_ref[...]
    h2 = jnp.maximum(h2, 0.0).astype(w3_ref.dtype)
    out = jnp.dot(h2, w3_ref[...], preferred_element_type=jnp.float32) + b3_ref[...]
    o_ref[...] = out.astype(o_ref.dtype)


def metadata_mlp(x, params, *, tb=1024, use_bf16=False):
    """x: [B, input_features]; params: dict of w1,b1,w2,b2,w3,b3 (W stored [in,out])."""
    B, F_in = x.shape
    w1, b1 = params["w1"], params["b1"]
    w2, b2 = params["w2"], params["b2"]
    w3, b3 = params["w3"], params["b3"]
    F_out = w3.shape[1]

    if use_bf16:
        # bf16 MXU operands (x, W, and the intermediate activations via the
        # astype(w_ref.dtype) in the kernel); accumulation / biases / output
        # stay f32.  ~2-3x MXU throughput and half the x-tile DMA.
        x = x.astype(jnp.bfloat16)
        w1 = w1.astype(jnp.bfloat16)
        w2 = w2.astype(jnp.bfloat16)
        w3 = w3.astype(jnp.bfloat16)

    # --- Batch tiling -------------------------------------------------------
    # * Large tiles amortize the ~0.35us per-grid-step overhead.
    # * Padding is bounded: B is only rounded up to `quantum`, never to `tb`.
    # * If B is large enough, force >= 2 grid steps so the "parallel" batch
    #   axis can shard across both TensorCores on v7x.
    quantum = 16 if use_bf16 else 8  # sublane quantum (bf16 packs rows in pairs)
    n_tiles = max(_cdiv(B, tb), 2 if B >= 2 * quantum else 1)
    tb_eff = _round_up(_cdiv(B, n_tiles), quantum)
    grid_b = _cdiv(B, tb_eff)
    B_pad = grid_b * tb_eff

    if B_pad != B:
        # Padded rows produce non-zero garbage (ReLU(b1) propagates through the
        # net); they are sliced off below and must never be reduced over.
        x = jnp.pad(x, ((0, B_pad - B), (0, 0)))

    # VMEM @ tb_eff=1024, f32: x tile 2x512KiB + out tile 2x512KiB + h1/h2
    # ~1MiB + weights ~0.1MiB  =>  well under the scoped default on all of
    # v5e/v6e/v7x, so no vmem_limit override needed.
    out = pl.pallas_call(
        _mlp_kernel,
        out_shape=jax.ShapeDtypeStruct((B_pad, F_out), jnp.float32),
        grid_spec=pltpu.PrefetchScalarGridSpec(
            num_scalar_prefetch=0,
            grid=(grid_b,),
            in_specs=[
                pl.BlockSpec((tb_eff, F_in), lambda i: (i, 0)),   # x tile
                pl.BlockSpec(w1.shape, lambda i: (0, 0)),          # w1 (resident)
                pl.BlockSpec(b1.shape, lambda i: (0, 0)),          # b1
                pl.BlockSpec(w2.shape, lambda i: (0, 0)),          # w2
                pl.BlockSpec(b2.shape, lambda i: (0, 0)),          # b2
                pl.BlockSpec(w3.shape, lambda i: (0, 0)),          # w3
                pl.BlockSpec(b3.shape, lambda i: (0, 0)),          # b3
            ],
            out_specs=pl.BlockSpec((tb_eff, F_out), lambda i: (i, 0)),
        ),
        compiler_params=pltpu.CompilerParams(
            # Batch axis is embarrassingly parallel -> megacore sharding on v7x.
            dimension_semantics=("parallel",),
        ),
    )(x, w1, b1, w2, b2, w3, b3)

    if B_pad != B:
        out = out[:B]
    return out


def init_params(key, input_features, output_features):
    """Deterministic init mimicking PyTorch nn.Linear default U(-1/sqrt(fan_in), 1/sqrt(fan_in))."""
    dims = [(input_features, 64), (64, 128), (128, output_features)]
    params = {}
    for idx, (fan_in, fan_out) in enumerate(dims, start=1):
        key, kw, kb = jax.random.split(key, 3)
        bound = 1.0 / jnp.sqrt(float(fan_in))
        params[f"w{idx}"] = jax.random.uniform(
            kw, (fan_in, fan_out), jnp.float32, -bound, bound
        )
        params[f"b{idx}"] = jax.random.uniform(
            kb, (1, fan_out), jnp.float32, -bound, bound
        )
    return params


def reference_mlp(x, params):
    h1 = jnp.maximum(x @ params["w1"] + params["b1"], 0.0)
    h2 = jnp.maximum(h1 @ params["w2"] + params["b2"], 0.0)
    return h2 @ params["w3"] + params["b3"]


if __name__ == "__main__":
    key = jax.random.PRNGKey(0)
    input_features = 16
    output_features = 32

    key, kx, kp, kx2 = jax.random.split(key, 4)
    params = init_params(kp, input_features, output_features)

    # Small batch: splits into 2 tiles of 8 rows (>=2 grid steps for v7x), no padding.
    batch = 16
    x = jax.random.normal(kx, (batch, input_features), jnp.float32)
    out = jax.block_until_ready(metadata_mlp(x, params))
    ref = reference_mlp(x, params)
    assert out.shape == (batch, output_features)
    assert jnp.allclose(out, ref, atol=1e-5, rtol=1e-5), "mismatch vs reference (small batch)"

    # Larger, non-divisible batch: two 520-row tiles, only 3 padded rows.
    batch2 = 1037
    x2 = jax.random.normal(kx2, (batch2, input_features), jnp.float32)
    out2 = jax.block_until_ready(metadata_mlp(x2, params))
    ref2 = reference_mlp(x2, params)
    assert out2.shape == (batch2, output_features)
    assert jnp.allclose(out2, ref2, atol=1e-5, rtol=1e-5), "mismatch vs reference (large batch)"

    # Optional bf16-operand path (f32 accumulation/output); loose tolerance.
    out3 = jax.block_until_ready(metadata_mlp(x2, params, use_bf16=True))
    assert out3.shape == (batch2, output_features)
    assert jnp.allclose(out3, ref2, atol=5e-2, rtol=5e-2), "mismatch vs reference (bf16 path)"

    print("KERNEL_OK")
</pallas_src>

<mosaic_0001>
module attributes {stable_mosaic.version = 11 : i64} {
  func.func @_mlp_kernel(%arg0: i32, %arg1: memref<8x16xf32, #tpu.memory_space<vmem>>, %arg2: memref<16x64xf32, #tpu.memory_space<vmem>>, %arg3: memref<1x64xf32, #tpu.memory_space<vmem>>, %arg4: memref<64x128xf32, #tpu.memory_space<vmem>>, %arg5: memref<1x128xf32, #tpu.memory_space<vmem>>, %arg6: memref<128x32xf32, #tpu.memory_space<vmem>>, %arg7: memref<1x32xf32, #tpu.memory_space<vmem>>, %arg8: memref<8x32xf32, #tpu.memory_space<vmem>>) attributes {dimension_semantics = [#tpu.dimension_semantics<parallel>], iteration_bounds = array<i64: 2>, scalar_prefetch = 0 : i64, scratch_operands = 0 : i64, tpu.core_type = #tpu.core_type<tc>, window_params = [{transform_indices = @transform_0, window_bounds = array<i64: 8, 16>}, {pipeline_mode = #tpu.pipeline_mode<synchronous>, transform_indices = @transform_1, window_bounds = array<i64: 16, 64>}, {pipeline_mode = #tpu.pipeline_mode<synchronous>, transform_indices = @transform_2, window_bounds = array<i64: 1, 64>}, {pipeline_mode = #tpu.pipeline_mode<synchronous>, transform_indices = @transform_3, window_bounds = array<i64: 64, 128>}, {pipeline_mode = #tpu.pipeline_mode<synchronous>, transform_indices = @transform_4, window_bounds = array<i64: 1, 128>}, {pipeline_mode = #tpu.pipeline_mode<synchronous>, transform_indices = @transform_5, window_bounds = array<i64: 128, 32>}, {pipeline_mode = #tpu.pipeline_mode<synchronous>, transform_indices = @transform_6, window_bounds = array<i64: 1, 32>}, {transform_indices = @transform_7, window_bounds = array<i64: 8, 32>}]} {
    %c0 = arith.constant 0 : index
    %c0_0 = arith.constant 0 : index
    %0 = vector.load %arg1[%c0, %c0_0] : memref<8x16xf32, #tpu.memory_space<vmem>>, vector<8x16xf32>
    %c0_1 = arith.constant 0 : index
    %c0_2 = arith.constant 0 : index
    %1 = vector.load %arg2[%c0_1, %c0_2] : memref<16x64xf32, #tpu.memory_space<vmem>>, vector<16x64xf32>
    %cst = arith.constant dense<0.000000e+00> : vector<8x64xf32>
    %2 = tpu.matmul %0, %1, %cst {dimension_numbers = #tpu.dot_dimension_numbers<[1], [0], [0], [1], [0, 0, 1, 1], [], []>} : vector<8x16xf32>, vector<16x64xf32>, vector<8x64xf32> -> vector<8x64xf32>
    %c0_3 = arith.constant 0 : index
    %c0_4 = arith.constant 0 : index
    %3 = vector.load %arg3[%c0_3, %c0_4] : memref<1x64xf32, #tpu.memory_space<vmem>>, vector<1x64xf32>
    %4 = vector.broadcast %3 : vector<1x64xf32> to vector<8x64xf32>
    %5 = arith.addf %2, %4 : vector<8x64xf32>
    %cst_5 = arith.constant 0.000000e+00 : f32
    %6 = vector.broadcast %cst_5 : f32 to vector<8x64xf32>
    %7 = arith.maximumf %5, %6 : vector<8x64xf32>
    %c0_6 = arith.constant 0 : index
    %c0_7 = arith.constant 0 : index
    %8 = vector.load %arg4[%c0_6, %c0_7] : memref<64x128xf32, #tpu.memory_space<vmem>>, vector<64x128xf32>
    %cst_8 = arith.constant dense<0.000000e+00> : vector<8x128xf32>
    %9 = tpu.matmul %7, %8, %cst_8 {dimension_numbers = #tpu.dot_dimension_numbers<[1], [0], [0], [1], [0, 0, 1, 1], [], []>} : vector<8x64xf32>, vector<64x128xf32>, vector<8x128xf32> -> vector<8x128xf32>
    %c0_9 = arith.constant 0 : index
    %c0_10 = arith.constant 0 : index
    %10 = vector.load %arg5[%c0_9, %c0_10] : memref<1x128xf32, #tpu.memory_space<vmem>>, vector<1x128xf32>
    %11 = vector.broadcast %10 : vector<1x128xf32> to vector<8x128xf32>
    %12 = arith.addf %9, %11 : vector<8x128xf32>
    %cst_11 = arith.constant 0.000000e+00 : f32
    %13 = vector.broadcast %cst_11 : f32 to vector<8x128xf32>
    %14 = arith.maximumf %12, %13 : vector<8x128xf32>
    %c0_12 = arith.constant 0 : index
    %c0_13 = arith.constant 0 : index
    %15 = vector.load %arg6[%c0_12, %c0_13] : memref<128x32xf32, #tpu.memory_space<vmem>>, vector<128x32xf32>
    %cst_14 = arith.constant dense<0.000000e+00> : vector<8x32xf32>
    %16 = tpu.matmul %14, %15, %cst_14 {dimension_numbers = #tpu.dot_dimension_numbers<[1], [0], [0], [1], [0, 0, 1, 1], [], []>} : vector<8x128xf32>, vector<128x32xf32>, vector<8x32xf32> -> vector<8x32xf32>
    %c0_15 = arith.constant 0 : index
    %c0_16 = arith.constant 0 : index
    %17 = vector.load %arg7[%c0_15, %c0_16] : memref<1x32xf32, #tpu.memory_space<vmem>>, vector<1x32xf32>
    %18 = vector.broadcast %17 : vector<1x32xf32> to vector<8x32xf32>
    %19 = arith.addf %16, %18 : vector<8x32xf32>
    %c0_17 = arith.constant 0 : index
    %c0_18 = arith.constant 0 : index
    %20 = vector.load %arg8[%c0_17, %c0_18] : memref<8x32xf32, #tpu.memory_space<vmem>>, vector<8x32xf32>
    tpu.vector_store %arg8[%c0_17, %c0_18], %19 {strides = array<i32>} : memref<8x32xf32, #tpu.memory_space<vmem>>, vector<8x32xf32>,
    return
  }
  func.func @transform_0(%arg0: i32) -> (i32, i32) {
    %c0_i32 = arith.constant 0 : i32
    %c0_i32_0 = arith.constant 0 : i32
    return %arg0, %c0_i32 : i32, i32
  }
  func.func @transform_1(%arg0: i32) -> (i32, i32) {
    %c0_i32 = arith.constant 0 : i32
    %c0_i32_0 = arith.constant 0 : i32
    %c0_i32_1 = arith.constant 0 : i32
    return %c0_i32, %c0_i32_0 : i32, i32
  }
  func.func @transform_2(%arg0: i32) -> (i32, i32) {
    %c0_i32 = arith.constant 0 : i32
    %c0_i32_0 = arith.constant 0 : i32
    %c0_i32_1 = arith.constant 0 : i32
    return %c0_i32, %c0_i32_0 : i32, i32
  }
  func.func @transform_3(%arg0: i32) -> (i32, i32) {
    %c0_i32 = arith.constant 0 : i32
    %c0_i32_0 = arith.constant 0 : i32
    %c0_i32_1 = arith.constant 0 : i32
    return %c0_i32, %c0_i32_0 : i32, i32
  }
  func.func @transform_4(%arg0: i32) -> (i32, i32) {
    %c0_i32 = arith.constant 0 : i32
    %c0_i32_0 = arith.constant 0 : i32
    %c0_i32_1 = arith.constant 0 : i32
    return %c0_i32, %c0_i32_0 : i32, i32
  }
  func.func @transform_5(%arg0: i32) -> (i32, i32) {
    %c0_i32 = arith.constant 0 : i32
    %c0_i32_0 = arith.constant 0 : i32
    %c0_i32_1 = arith.constant 0 : i32
    return %c0_i32, %c0_i32_0 : i32, i32
  }
  func.func @transform_6(%arg0: i32) -> (i32, i32) {
    %c0_i32 = arith.constant 0 : i32
    %c0_i32_0 = arith.constant 0 : i32
    %c0_i32_1 = arith.constant 0 : i32
    return %c0_i32, %c0_i32_0 : i32, i32
  }
  func.func @transform_7(%arg0: i32) -> (i32, i32) {
    %c0_i32 = arith.constant 0 : i32
    %c0_i32_0 = arith.constant 0 : i32
    return %arg0, %c0_i32 : i32, i32
  }
}

</mosaic_0001>

<bundles_post_ra>
// kernel: tpu_custom_call.1
= control target key start
LH: loop header
LB: loop body
LE: loop exit
PB: predicated region body
PF: predicated region fallthrough
CT: control target
= control target key end

     0   :  { %12 = vsyncpa [#allocation3], 0  ;;  %s790_s0 = inlined_call_operand.vmem [shape: f32[16,16], index: 0, kind: input, shape index: {}]   ;;  %s791_s1 = inlined_call_operand.vmem [shape: f32[16,64], index: 1, kind: input, shape index: {}]   ;;  %s792_s2 = inlined_call_operand.vmem [shape: f32[1,64], index: 2, kind: input, shape index: {}]   ;;  %s793_s3 = inlined_call_operand.vmem [shape: f32[64,128], index: 3, kind: input, shape index: {}]   ;;  %s794_s4 = inlined_call_operand.vmem [shape: f32[1,128], index: 4, kind: input, shape index: {}]   ;;  %s795_s5 = inlined_call_operand.vmem [shape: f32[128,32], index: 5, kind: input, shape index: {}]   ;;  %s796_s6 = inlined_call_operand.vmem [shape: f32[1,32], index: 6, kind: input, shape index: {}]   ;;  %s797_s7 = inlined_call_operand.hbm [shape: f32[16,32], index: 7, kind: output, shape index: {}]  }
   0x1   :  { %14 = vsyncpa [#allocation3 + $0x1], 0  ;;  %s618_s24 = smov 0   ;;  %s620_s25 = smov 0  }
   0x2   :  { %s622_s26 = smov 0   ;;  %s624_s27 = smov 0  }
   0x3 LB: > { %s639_s28 = sadd.s32 4294967295, %s576_s27   ;;  %s460_s29 = sadd.s32 4294967294, %s576_s27   ;;  %s576_s27 = sphi %s624_s27, %s803_s27   ;;  %s572_s26 = sphi %s622_s26, %s802_s26   ;;  %s568_s25 = sphi %s620_s25, %s801_s25   ;;  %s564_s24 = sphi %s618_s24, %s800_s24  }
   0x4   : > { %s643_s30 = sadd.s32 1, %s576_s27   ;;  %s179_s8 = sadd.s32 1, %s572_s26 }
   0x5   : > { %s176_s9 = ssub.s32 %s576_s27, %s643_s30  ;;  %p189_p0 = scmp.ne.s32.totalorder %s572_s26, %s568_s25 }
   0x6   : > { %p177_p1 = scmp.eq.s32.totalorder %s176_s9, 0  ;;  %p190_p2 = scmp.eq.s32.totalorder %s639_s28, 1 }
   0x7   : > { %p195_p3 = scmp.ne.s32.totalorder %s568_s25, %s564_s24  ;;  %p196_p4 = scmp.eq.s32.totalorder %s460_s29, 1 }
   0x8   : > { %s654_s10 = scalar_select %p177_p1, %s572_s26, %s179_s8  }
   0x9   : > { %p656_p5 = por %p190_p2, %p189_p0  ;;  %p660_p6 = por %p196_p4, %p195_p3 }
   0xa   : > { %p463_p7 = scmp.ge.s32.totalorder %s576_s27, 1  ;;  %p239_p8 = scmp.lt.s32.totalorder %s576_s27, 3 }
   0xc   : > { %p240_p9 = pnand %p463_p7, %p239_p8 }
   0xd   : > { %p270_p10 = scmp.lt.s32.totalorder (!%p240_p9), %s639_s28, 1  ;;  %s267_s18 = sand.u32 (!%p240_p9), 1, %s568_s25  }
   0xe   : > { %243 = sbr.rel (%p240_p9) target bundleno = 421 (0x1a5), region = 48  ;;  %s464_s19 = sshll.u32 (!%p240_p9), %s267_s18, 3 }
   0xf   : > { %s469_s20 = sshll.u32 (!%p240_p9), %s639_s28, 3  ;;  %s269_s9 = scalar_lea.vmem (!%p240_p9), [#allocation2], %s464_s19 }
  0x10   : > { %s396_s23 = scalar_lea.hbm (!%p240_p9), %s797_s7, %s469_s20  ;;  %s398_s13 = sshll.u32 (!%p240_p9), %s269_s9, 4  ;;  %s399_s13 = int_to_ptr.vmem [resolvable:$true] %s398_s13 }
  0x11   : > { %s400_s14 = sshll.u32 (!%p240_p9), %s396_s23, 4  ;;  %s534_s19 = scalar_lea.hbm (!%p240_p9), %s797_s7, 16  ;;  %s401_s14 = int_to_ptr.hbm [resolvable:$true] %s400_s14 }
  0x13   : > { %v276_v0 = vld [vmem:[%s791_s1 + $0x8] sm:$0xff]  ;;  %v275_v1 = vld [vmem:[%s791_s1] sm:$0xff]  ;;  %v313_v2 = vld [vmem:[%s793_s3 + $0x38] sm:$0xff]  ;;  %s271_s21 = scalar_select %p270_p10, %s639_s28, 1  ;;  %vm281_vm0 = vcmask 130048   ;;  %vm318_vm1 = vcmask 523264  }
  0x14   : > { %299 = vmatpush.msra.mxu0 %v276_v0  ;;  %330 = vmatpush.msra.mxu1 %v313_v2  ;;  %v312_v3 = vld [vmem:[%s793_s3 + $0x30] sm:$0xff]  ;;  %v311_v4 = vld [vmem:[%s793_s3 + $0x28] sm:$0xff]  ;;  %v310_v5 = vld [vmem:[%s793_s3 + $0x20] sm:$0xff]  ;;  %vm383_vm2 = vcmask 261120   ;;  %s528_s28 = sshra.s32 %s401_s14, 4  ;;  %s529_s28 = int_to_ptr.hbm [resolvable:$true] %s528_s28 }
  0x15   : > { %s465_s29 = sshll.u32 %s271_s21, 3  ;;  %v309_v7 = vld [vmem:[%s793_s3 + $0x18] sm:$0xff]  ;;  %v308_v8 = vld [vmem:[%s793_s3 + $0x10] sm:$0xff]  ;;  %v307_v9 = vld [vmem:[%s793_s3 + $0x8] sm:$0xff]  ;;  %s530_s16 = scalar_lea.hbm %s529_s28, 8 }
  0x16   : > { %300 = vmatpush.msra.mxu0 %v275_v1  ;;  %331 = vmatpush.msra.mxu1 %v312_v3  ;;  %s273_s15 = scalar_lea.vmem %s790_s0, %s465_s29  ;;  %v306_v10 = vld [vmem:[%s793_s3] sm:$0xff]  ;;  %v358_v11 = vld [vmem:[%s795_s5 + $0x78] sm:$0xff]  ;;  %v357_v12 = vld [vmem:[%s795_s5 + $0x70] sm:$0xff]  ;;  %p531_p11 = scmp.ne.s32.totalorder %s529_s28, %s530_s16 }
  0x17   : > { %v274_v6 = vld [vmem:[%s273_s15] sm:$0xff]  ;;  %363 = vmatpush.msra.mxu2 %v358_v11  ;;  %v356_v13 = vld [vmem:[%s795_s5 + $0x68] sm:$0xff]  ;;  %v354_v15 = vld [vmem:[%s795_s5 + $0x58] sm:$0xff]  ;;  %s386_s15 = scalar_lea.sflag [#allocation3], %s267_s18  ;;  %p535_p0 = scmp.lt.s32.totalorder %s529_s28, %s797_s7 }
  0x18   : > { %332 = vmatpush.msra.mxu1 %v311_v4  ;;  %466 = vmatmul.msk.f32.vlgmr.msra.gmra.mxu0 %vm281_vm0, %v274_v6  ;;  %v355_v14 = vld [vmem:[%s795_s5 + $0x60] sm:$0xff]  ;;  %v353_v16 = vld [vmem:[%s795_s5 + $0x50] sm:$0xff]  ;;  %v352_v17 = vld [vmem:[%s795_s5 + $0x48] sm:$0xff]  ;;  %p532_p12 = pnand %p531_p11, %p656_p5  ;;  %p536_p1 = scmp.lt.s32.totalorder %s534_s19, %s530_s16 }
  0x19   : > { %364 = vmatpush.msra.mxu2 %v357_v12  ;;  %v351_v18 = vld [vmem:[%s795_s5 + $0x40] sm:$0xff]  ;;  %v350_v19 = vld [vmem:[%s795_s5 + $0x38] sm:$0xff]  ;;  %v349_v20 = vld [vmem:[%s795_s5 + $0x30] sm:$0xff] }
  0x1a   : > { %333 = vmatpush.msra.mxu1 %v310_v5  ;;  %v348_v21 = vld [vmem:[%s795_s5 + $0x28] sm:$0xff]  ;;  %v347_v22 = vld [vmem:[%s795_s5 + $0x20] sm:$0xff]  ;;  %v346_v23 = vld [vmem:[%s795_s5 + $0x18] sm:$0xff]  ;;  %p533_p13 = pneg %p532_p12  ;;  %p537_p2 = por %p536_p1, %p535_p0 }
  0x1b   : > { %365 = vmatpush.msra.mxu2 %v356_v13  ;;  %v511_v24 = vld [vmem:[%s792_s2] ss:$0 sm:$0xff]  ;;  %v345_v28 = vld [vmem:[%s795_s5 + $0x10] sm:$0xff]  ;;  %v344_v29 = vld [vmem:[%s795_s5 + $0x8] sm:$0xff] }
  0x1c   : > { %334 = vmatpush.msra.mxu1 %v309_v7  ;;  %v343_v30 = vld [vmem:[%s795_s5] sm:$0xff]  ;;  %p538_p3 = pnand %p537_p2, %p533_p13 }
  0x1d   : > { %366 = vmatpush.msra.mxu2 %v355_v14  ;;  %v512_v31 = vld [vmem:[%s794_s4] ss:$0 sm:$0xff] }
  0x1e   : > { %335 = vmatpush.msra.mxu1 %v308_v8  ;;  %v513_v35 = vld [vmem:[%s796_s6] ss:$0 sm:$0xff] }
  0x1f   : > { %367 = vmatpush.msra.mxu2 %v354_v15 }
  0x20   : > { %336 = vmatpush.msra.mxu1 %v307_v9 }
  0x21   : > { %368 = vmatpush.msra.mxu2 %v353_v16 }
  0x22   : > { %337 = vmatpush.msra.mxu1 %v306_v10 }
  0x23   : > { %369 = vmatpush.msra.mxu2 %v352_v17 }
  0x25   : > { %370 = vmatpush.msra.mxu2 %v351_v18 }
  0x27   : > { %371 = vmatpush.msra.mxu2 %v350_v19 }
  0x29   : > { %372 = vmatpush.msra.mxu2 %v349_v20 }
  0x2b   : > { %373 = vmatpush.msra.mxu2 %v348_v21 }
  0x2d   : > { %374 = vmatpush.msra.mxu2 %v347_v22 }
  0x2f   : > { %375 = vmatpush.msra.mxu2 %v346_v23 }
  0x31   : > { %376 = vmatpush.msra.mxu2 %v345_v28 }
  0x33   : > { %377 = vmatpush.msra.mxu2 %v344_v29 }
  0x35   : > { %378 = vmatpush.msra.mxu2 %v343_v30 }
  0x95   : > { %v302_v25 = vpop.f32.mrf.mxu0 }
  0x96   : > { %v303_v26 = vadd.f32 %v511_v24, %v302_v25 }
  0x98   : > { %v305_v27 = vmax.f32 %v303_v26, 0.0 }
  0x9a   : > { %467 = vmatmul.msk.f32.vlgmr.msra.gmra.mxu1 %vm318_vm1, %v305_v27 }
 0x117   : > { %v339_v32 = vpop.f32.mrf.mxu1 }
 0x118   : > { %v340_v33 = vadd.f32 %v512_v31, %v339_v32 }
 0x11a   : > { %v342_v34 = vmax.f32 %v340_v33, 0.0 }
 0x11c   : > { %379 = vmatmul.f32.vlgmr.msra.gmra.mxu2 %v342_v34 }
 0x19f   : > { %v380_v36 = vpop.f32.mrf.mxu2 }
 0x1a0   : > { %v381_v37 = vadd.f32 %v513_v35, %v380_v36 }
 0x1a2   : > { %384 = vst.msk [vmem:[%s269_s9] sm:$0xff] %vm383_vm2, %v381_v37 }
 0x1a3   : > { %541 = shalt.err (!%p538_p3)
}
 0x1a4   : > { %472 = dma.vmem_to_hbm [thread:$0]  (%p656_p5), %s399_s13, 128, %s401_s14, %s386_s15  }
 0x1a5 PF: > { %p478_p4 = scmp.ge.s32.totalorder %s576_s27, 2  ;;  %s412_s18 = sand.u32 1, %s564_s24  }
 0x1a6   : > { %s413_s23 = scalar_lea.sflag [#allocation3], %s412_s18 }
 0x1a7   : > { %p475_p7 = pnand %p478_p4, %p660_p6 }
 0x1a9   : > { %p476_p8 = pneg %p475_p7 }
 0x1ab   : > { %559 = dma.done.wait (%p476_p8), %s413_s23, 128  }
 0x1ac   : > { %561 = vsyncadd (%p476_p8), %s413_s23, 4294967168  ;;  %p17_p9 = scmp.ge.s32.totalorder %s643_s30, 4   ;;  %s800_s24 = smov %s568_s25 }
 0x1ad   : > { %s801_s25 = smov %s572_s26  ;;  %s802_s26 = smov %s654_s10 }
 0x1ae   : > { %s803_s27 = smov %s643_s30  ;;  %19 = sbr.rel (!%p17_p9) target bundleno = 3 (0x3), region = 83 }
 0x1b3   :  { %419 = vsyncpa [#allocation3], 1 }
 0x1b4   :  { %421 = vsyncpa [#allocation3 + $0x1], 1 }

</bundles_post_ra>
